<compile_context>
chip_gen: v5e
topology: v5e:2x2
jax: 0.10.0
libtpu: 0.0.40
codegen_flags: <defaults>
</compile_context>

<pallas_src>
import jax
import jax.numpy as jnp
from jax.experimental import pallas as pl
from jax.experimental.pallas import tpu as pltpu


def mlp_kernel(x_ref, w1_ref, b1_ref, w2_ref, b2_ref, w3_ref, b3_ref, o_ref):
    """Fused 3-layer MLP on one batch tile (MXU matmuls, f32 accumulation, VPU bias+ReLU)."""
    # Fused input cast: f32 HBM read -> compute dtype in-register.
    x = x_ref[...].astype(w1_ref.dtype)
    h1 = jnp.dot(x, w1_ref[...], preferred_element_type=jnp.float32) + b1_ref[...]
    h1 = jnp.maximum(h1, 0.0).astype(w2_ref.dtype)
    h2 = jnp.dot(h1, w2_ref[...], preferred_element_type=jnp.float32) + b2_ref[...]
    h2 = jnp.maximum(h2, 0.0).astype(w3_ref.dtype)
    out = jnp.dot(h2, w3_ref[...], preferred_element_type=jnp.float32) + b3_ref[...]
    # Store only the valid (unpadded) output columns; avoids a padded f32 write + wrapper slice.
    o_ref[...] = out[:, : o_ref.shape[-1]].astype(o_ref.dtype)


def _num_tensorcores_per_chip():
    """2 on v7x (dual TensorCore), 1 on v5e/v6e. Defaults to 1 if detection fails."""
    try:
        kind = jax.devices()[0].device_kind.lower()
        if "v7" in kind:
            return 2
    except Exception:
        pass
    return 1


def _choose_batch_tile(B):
    """Pick the batch tile.

    Single-TC chips (v5e/v6e): one big tile (grid loop is serial; more steps = pure overhead).
    Dual-TC (v7x): split into 2 equal steps only when B is large enough (>= 512) to be worth it.
    Tiles are multiples of 8 (sublane); cap 2048 rows keeps VMEM well inside default limits
    (~2 KB/row double-buffered + ~100 KB weights ≈ 4 MiB at the cap).
    """
    CAP = 2048
    if B <= 16 or (B % 8 != 0 and B <= CAP):
        return B  # single full-array block (block == full dim is always legal)
    tb = max(8, (min(B, CAP) // 8) * 8)
    if _num_tensorcores_per_chip() >= 2 and B >= 512:
        half = -(-B // 2)            # ceil(B / 2)
        half = -(-half // 8) * 8     # round up to a multiple of 8 -> exactly 2 grid steps
        tb = min(tb, half)
    return tb


def prepare_params(params, compute_dtype=jnp.bfloat16):
    """One-time preparation of model constants (hoisted out of the per-forward path).

    params are (w1, b1, w2, b2, w3, b3) with weights stored transposed vs. PyTorch, i.e.
    (in_features, out_features), so the kernel computes x @ W + b.
    """
    w1, b1, w2, b2, w3, b3 = params
    out_features = w3.shape[1]
    out_pad = max(128, -(-out_features // 128) * 128)  # lane-dense width for the last matmul
    w3p = jnp.zeros((w3.shape[0], out_pad), w3.dtype).at[:, :out_features].set(w3)
    b3p = jnp.zeros((1, out_pad), jnp.float32).at[:, :out_features].set(
        b3.reshape(1, -1).astype(jnp.float32))
    return {
        "w1": w1.astype(compute_dtype),
        "b1": b1.reshape(1, -1).astype(jnp.float32),
        "w2": w2.astype(compute_dtype),
        "b2": b2.reshape(1, -1).astype(jnp.float32),
        "w3": w3p.astype(compute_dtype),
        "b3": b3p,
        "out_features": out_features,
    }


def origin_model_forward(x, prepped, *, tb=None):
    """x: (B, 256) float32 -> (B, 10) float32."""
    w1, b1 = prepped["w1"], prepped["b1"]
    w2, b2 = prepped["w2"], prepped["b2"]
    w3, b3 = prepped["w3"], prepped["b3"]
    OUT = prepped["out_features"]

    B, F_IN = x.shape
    H1 = w1.shape[1]
    H2 = w2.shape[1]
    OUT_PAD = w3.shape[1]

    if tb is None:
        tb = _choose_batch_tile(B)
    grid = (pl.cdiv(B, tb),)

    w_itemsize = jnp.dtype(w1.dtype).itemsize
    flops = 2 * B * (F_IN * H1 + H1 * H2 + H2 * OUT_PAD)
    bytes_accessed = (
        B * F_IN * 4                                            # x (f32)
        + (F_IN * H1 + H1 * H2 + H2 * OUT_PAD) * w_itemsize     # weights
        + (H1 + H2 + OUT_PAD) * 4                               # biases (f32)
        + B * OUT * 4                                           # output (f32, unpadded)
    )

    return pl.pallas_call(
        mlp_kernel,
        out_shape=jax.ShapeDtypeStruct((B, OUT), jnp.float32),
        grid_spec=pltpu.PrefetchScalarGridSpec(
            num_scalar_prefetch=0,
            grid=grid,
            in_specs=[
                # x: tiled over batch, cast to bf16 inside the kernel
                pl.BlockSpec((tb, F_IN), lambda i: (i, 0)),
                # weights / biases: full arrays, constant block index -> stay VMEM-resident
                pl.BlockSpec((F_IN, H1), lambda i: (0, 0)),
                pl.BlockSpec((1, H1), lambda i: (0, 0)),
                pl.BlockSpec((H1, H2), lambda i: (0, 0)),
                pl.BlockSpec((1, H2), lambda i: (0, 0)),
                pl.BlockSpec((H2, OUT_PAD), lambda i: (0, 0)),
                pl.BlockSpec((1, OUT_PAD), lambda i: (0, 0)),
            ],
            out_specs=pl.BlockSpec((tb, OUT), lambda i: (i, 0)),
        ),
        compiler_params=pltpu.CompilerParams(
            dimension_semantics=("parallel",),
        ),
        cost_estimate=pl.CostEstimate(
            flops=flops, transcendentals=0, bytes_accessed=bytes_accessed
        ),
    )(x, w1, b1, w2, b2, w3, b3)


def init_params(key, last_layer_feature=256):
    """Deterministic synthetic init mirroring nn.Linear shapes (stored transposed: (in, out))."""
    k1, k2, k3, k4, k5, k6 = jax.random.split(key, 6)

    def unif(k, shape, fan_in):
        bound = 1.0 / jnp.sqrt(fan_in)
        return jax.random.uniform(k, shape, jnp.float32, -bound, bound)

    w1 = unif(k1, (last_layer_feature, 128), last_layer_feature)
    b1 = unif(k2, (1, 128), last_layer_feature)
    w2 = unif(k3, (128, 128), 128)
    b2 = unif(k4, (1, 128), 128)
    w3 = unif(k5, (128, 10), 128)
    b3 = unif(k6, (1, 10), 128)
    return (w1, b1, w2, b2, w3, b3)


def reference_forward(x, params):
    w1, b1, w2, b2, w3, b3 = params
    h1 = jnp.maximum(x @ w1 + b1, 0.0)
    h2 = jnp.maximum(h1 @ w2 + b2, 0.0)
    return h2 @ w3 + b3


if __name__ == "__main__":
    key = jax.random.PRNGKey(0)
    kx, kp = jax.random.split(key)

    B, F_IN = 64, 256
    x = jax.random.normal(kx, (B, F_IN), jnp.float32)
    params = init_params(kp, last_layer_feature=F_IN)

    # One-time constant preparation (hoisted out of the forward path).
    prepped_bf16 = prepare_params(params, compute_dtype=jnp.bfloat16)
    prepped_f32 = prepare_params(params, compute_dtype=jnp.float32)

    # Default (bf16 matmuls, f32 accumulation) path: single grid step for this small B.
    out = jax.block_until_ready(origin_model_forward(x, prepped_bf16))

    # Pure-f32 path for a tight numerical check of the kernel structure itself.
    out_f32 = jax.block_until_ready(origin_model_forward(x, prepped_f32))

    # Exercise the multi-step batch tiling path (2 grid steps of 32 rows).
    out_tiled = jax.block_until_ready(origin_model_forward(x, prepped_f32, tb=32))

    ref = reference_forward(x, params)
    assert out.shape == (B, 10)
    assert jnp.allclose(out_f32, ref, atol=1e-5, rtol=1e-5)
    assert jnp.allclose(out_tiled, ref, atol=1e-5, rtol=1e-5)
    assert jnp.allclose(out, ref, atol=3e-2, rtol=3e-2)  # bf16 operands, f32 accumulation

    print("KERNEL_OK")
</pallas_src>

<mosaic_0001>
module attributes {stable_mosaic.version = 11 : i64} {
  func.func @mlp_kernel(%arg0: i32, %arg1: memref<64x256xf32, #tpu.memory_space<vmem>>, %arg2: memref<256x128xbf16, #tpu.memory_space<vmem>>, %arg3: memref<1x128xf32, #tpu.memory_space<vmem>>, %arg4: memref<128x128xbf16, #tpu.memory_space<vmem>>, %arg5: memref<1x128xf32, #tpu.memory_space<vmem>>, %arg6: memref<128x128xbf16, #tpu.memory_space<vmem>>, %arg7: memref<1x128xf32, #tpu.memory_space<vmem>>, %arg8: memref<64x10xf32, #tpu.memory_space<vmem>>) attributes {dimension_semantics = [#tpu.dimension_semantics<parallel>], iteration_bounds = array<i64: 1>, scalar_prefetch = 0 : i64, scratch_operands = 0 : i64, tpu.core_type = #tpu.core_type<tc>, window_params = [{transform_indices = @transform_0, window_bounds = array<i64: 64, 256>}, {pipeline_mode = #tpu.pipeline_mode<synchronous>, transform_indices = @transform_1, window_bounds = array<i64: 256, 128>}, {pipeline_mode = #tpu.pipeline_mode<synchronous>, transform_indices = @transform_2, window_bounds = array<i64: 1, 128>}, {pipeline_mode = #tpu.pipeline_mode<synchronous>, transform_indices = @transform_3, window_bounds = array<i64: 128, 128>}, {pipeline_mode = #tpu.pipeline_mode<synchronous>, transform_indices = @transform_4, window_bounds = array<i64: 1, 128>}, {pipeline_mode = #tpu.pipeline_mode<synchronous>, transform_indices = @transform_5, window_bounds = array<i64: 128, 128>}, {pipeline_mode = #tpu.pipeline_mode<synchronous>, transform_indices = @transform_6, window_bounds = array<i64: 1, 128>}, {transform_indices = @transform_7, window_bounds = array<i64: 64, 10>}]} {
    %c0 = arith.constant 0 : index
    %c0_0 = arith.constant 0 : index
    %0 = vector.load %arg1[%c0, %c0_0] : memref<64x256xf32, #tpu.memory_space<vmem>>, vector<64x256xf32>
    %1 = arith.truncf %0 : vector<64x256xf32> to vector<64x256xbf16>
    %c0_1 = arith.constant 0 : index
    %c0_2 = arith.constant 0 : index
    %2 = vector.load %arg2[%c0_1, %c0_2] : memref<256x128xbf16, #tpu.memory_space<vmem>>, vector<256x128xbf16>
    %cst = arith.constant dense<0.000000e+00> : vector<64x128xf32>
    %3 = tpu.matmul %1, %2, %cst {dimension_numbers = #tpu.dot_dimension_numbers<[1], [0], [0], [1], [0, 0, 1, 1], [], []>} : vector<64x256xbf16>, vector<256x128xbf16>, vector<64x128xf32> -> vector<64x128xf32>
    %c0_3 = arith.constant 0 : index
    %c0_4 = arith.constant 0 : index
    %4 = vector.load %arg3[%c0_3, %c0_4] : memref<1x128xf32, #tpu.memory_space<vmem>>, vector<1x128xf32>
    %5 = vector.broadcast %4 : vector<1x128xf32> to vector<64x128xf32>
    %6 = arith.addf %3, %5 : vector<64x128xf32>
    %cst_5 = arith.constant 0.000000e+00 : f32
    %7 = vector.broadcast %cst_5 : f32 to vector<64x128xf32>
    %8 = arith.maximumf %6, %7 : vector<64x128xf32>
    %9 = arith.truncf %8 : vector<64x128xf32> to vector<64x128xbf16>
    %c0_6 = arith.constant 0 : index
    %c0_7 = arith.constant 0 : index
    %10 = vector.load %arg4[%c0_6, %c0_7] : memref<128x128xbf16, #tpu.memory_space<vmem>>, vector<128x128xbf16>
    %cst_8 = arith.constant dense<0.000000e+00> : vector<64x128xf32>
    %11 = tpu.matmul %9, %10, %cst_8 {dimension_numbers = #tpu.dot_dimension_numbers<[1], [0], [0], [1], [0, 0, 1, 1], [], []>} : vector<64x128xbf16>, vector<128x128xbf16>, vector<64x128xf32> -> vector<64x128xf32>
    %c0_9 = arith.constant 0 : index
    %c0_10 = arith.constant 0 : index
    %12 = vector.load %arg5[%c0_9, %c0_10] : memref<1x128xf32, #tpu.memory_space<vmem>>, vector<1x128xf32>
    %13 = vector.broadcast %12 : vector<1x128xf32> to vector<64x128xf32>
    %14 = arith.addf %11, %13 : vector<64x128xf32>
    %cst_11 = arith.constant 0.000000e+00 : f32
    %15 = vector.broadcast %cst_11 : f32 to vector<64x128xf32>
    %16 = arith.maximumf %14, %15 : vector<64x128xf32>
    %17 = arith.truncf %16 : vector<64x128xf32> to vector<64x128xbf16>
    %c0_12 = arith.constant 0 : index
    %c0_13 = arith.constant 0 : index
    %18 = vector.load %arg6[%c0_12, %c0_13] : memref<128x128xbf16, #tpu.memory_space<vmem>>, vector<128x128xbf16>
    %cst_14 = arith.constant dense<0.000000e+00> : vector<64x128xf32>
    %19 = tpu.matmul %17, %18, %cst_14 {dimension_numbers = #tpu.dot_dimension_numbers<[1], [0], [0], [1], [0, 0, 1, 1], [], []>} : vector<64x128xbf16>, vector<128x128xbf16>, vector<64x128xf32> -> vector<64x128xf32>
    %c0_15 = arith.constant 0 : index
    %c0_16 = arith.constant 0 : index
    %20 = vector.load %arg7[%c0_15, %c0_16] : memref<1x128xf32, #tpu.memory_space<vmem>>, vector<1x128xf32>
    %21 = vector.broadcast %20 : vector<1x128xf32> to vector<64x128xf32>
    %22 = arith.addf %19, %21 : vector<64x128xf32>
    %23 = vector.extract_strided_slice %22 {offsets = [0, 0], sizes = [64, 10], strides = [1, 1]} : vector<64x128xf32> to vector<64x10xf32>
    %c0_17 = arith.constant 0 : index
    %c0_18 = arith.constant 0 : index
    %24 = vector.load %arg8[%c0_17, %c0_18] : memref<64x10xf32, #tpu.memory_space<vmem>>, vector<64x10xf32>
    tpu.vector_store %arg8[%c0_17, %c0_18], %23 {strides = array<i32>} : memref<64x10xf32, #tpu.memory_space<vmem>>, vector<64x10xf32>,
    return
  }
  func.func @transform_0(%arg0: i32) -> (i32, i32) {
    %c0_i32 = arith.constant 0 : i32
    %c0_i32_0 = arith.constant 0 : i32
    return %arg0, %c0_i32 : i32, i32
  }
  func.func @transform_1(%arg0: i32) -> (i32, i32) {
    %c0_i32 = arith.constant 0 : i32
    %c0_i32_0 = arith.constant 0 : i32
    %c0_i32_1 = arith.constant 0 : i32
    return %c0_i32, %c0_i32_0 : i32, i32
  }
  func.func @transform_2(%arg0: i32) -> (i32, i32) {
    %c0_i32 = arith.constant 0 : i32
    %c0_i32_0 = arith.constant 0 : i32
    %c0_i32_1 = arith.constant 0 : i32
    return %c0_i32, %c0_i32_0 : i32, i32
  }
  func.func @transform_3(%arg0: i32) -> (i32, i32) {
    %c0_i32 = arith.constant 0 : i32
    %c0_i32_0 = arith.constant 0 : i32
    %c0_i32_1 = arith.constant 0 : i32
    return %c0_i32, %c0_i32_0 : i32, i32
  }
  func.func @transform_4(%arg0: i32) -> (i32, i32) {
    %c0_i32 = arith.constant 0 : i32
    %c0_i32_0 = arith.constant 0 : i32
    %c0_i32_1 = arith.constant 0 : i32
    return %c0_i32, %c0_i32_0 : i32, i32
  }
  func.func @transform_5(%arg0: i32) -> (i32, i32) {
    %c0_i32 = arith.constant 0 : i32
    %c0_i32_0 = arith.constant 0 : i32
    %c0_i32_1 = arith.constant 0 : i32
    return %c0_i32, %c0_i32_0 : i32, i32
  }
  func.func @transform_6(%arg0: i32) -> (i32, i32) {
    %c0_i32 = arith.constant 0 : i32
    %c0_i32_0 = arith.constant 0 : i32
    %c0_i32_1 = arith.constant 0 : i32
    return %c0_i32, %c0_i32_0 : i32, i32
  }
  func.func @transform_7(%arg0: i32) -> (i32, i32) {
    %c0_i32 = arith.constant 0 : i32
    %c0_i32_0 = arith.constant 0 : i32
    return %arg0, %c0_i32 : i32, i32
  }
}

</mosaic_0001>

<bundles_post_ra>
// kernel: tpu_custom_call.1
= control target key start
LH: loop header
LB: loop body
LE: loop exit
PB: predicated region body
PF: predicated region fallthrough
CT: control target
= control target key end

     0   :  { %12 = vsyncpa [#allocation3], 0  ;;  %s911_s0 = inlined_call_operand.hbm [shape: f32[64,256], index: 0, kind: input, shape index: {}]   ;;  %s912_s1 = inlined_call_operand.hbm [shape: bf16[256,128], index: 1, kind: input, shape index: {}]   ;;  %s913_s2 = inlined_call_operand.vmem [shape: f32[1,128], index: 2, kind: input, shape index: {}]   ;;  %s914_s3 = inlined_call_operand.hbm [shape: bf16[128,128], index: 3, kind: input, shape index: {}]   ;;  %s915_s4 = inlined_call_operand.vmem [shape: f32[1,128], index: 4, kind: input, shape index: {}]   ;;  %s916_s5 = inlined_call_operand.hbm [shape: bf16[128,128], index: 5, kind: input, shape index: {}]   ;;  %s917_s6 = inlined_call_operand.vmem [shape: f32[1,128], index: 6, kind: input, shape index: {}]   ;;  %s918_s7 = inlined_call_operand.vmem [shape: f32[64,10], index: 7, kind: output, shape index: {}]  }
   0x1   :  { %13 = vsyncpa [#allocation5], 0  ;;  %s32_s26 = sshll.u32 %s912_s1, 4  ;;  %s33_s26 = int_to_ptr.hbm [resolvable:$true] %s32_s26 }
   0x2   :  { %14 = vsyncpa [#allocation8], 0  ;;  %s810_s27 = smov [#allocation4]   ;;  %s19_s8 = sshll.u32 %s911_s0, 4  ;;  %s20_s8 = int_to_ptr.hbm [resolvable:$true] %s19_s8 }
   0x3   :  { %s34_s28 = sshll.u32 %s810_s27, 4  ;;  %s811_s9 = smov 64   ;;  %s35_s28 = int_to_ptr.vmem [resolvable:$true] %s34_s28 }
   0x4   :  { %s812_s10 = smov 4   ;;  %s813_s11 = smov [#allocation2]  }
   0x5   :  { %40 = dma.hbm_to_vmem [thread:$0]  %s33_s26, 2048, %s35_s28, [#allocation5], %s811_s9, %s811_s9, %s812_s10  }
   0x6   :  { %s21_s12 = sshll.u32 %s813_s11, 4  ;;  %s814_s13 = smov 256   ;;  %s22_s12 = int_to_ptr.vmem [resolvable:$true] %s21_s12 }
   0x7   :  { %s815_s14 = smov 16   ;;  %s47_s16 = sshll.u32 %s914_s3, 4  ;;  %s48_s16 = int_to_ptr.hbm [resolvable:$true] %s47_s16 }
   0x8   :  { %27 = dma.hbm_to_vmem [thread:$0]  %s20_s8, 2048, %s22_s12, [#allocation3], %s814_s13, %s814_s13, %s815_s14  }
   0x9   :  { %s816_s17 = smov [#allocation6]   ;;  %s62_s20 = sshll.u32 %s916_s5, 4  ;;  %s63_s20 = int_to_ptr.hbm [resolvable:$true] %s62_s20 }
   0xa   :  { %s49_s18 = sshll.u32 %s816_s17, 4  ;;  %s817_s21 = smov [#allocation7]   ;;  %s50_s18 = int_to_ptr.vmem [resolvable:$true] %s49_s18 }
   0xb   :  { %55 = dma.hbm_to_vmem [thread:$0]  %s48_s16, 1024, %s50_s18, [#allocation5], %s811_s9, %s811_s9, %s812_s10  }
   0xc   :  { %s64_s22 = sshll.u32 %s817_s21, 4  ;;  %s65_s22 = int_to_ptr.vmem [resolvable:$true] %s64_s22 }
   0xd   :  { %70 = dma.hbm_to_vmem [thread:$0]  %s63_s20, 1024, %s65_s22, [#allocation8], %s811_s9, %s811_s9, %s812_s10  }
   0xe   :  { %804 = dma.done.wait [#allocation3], 2048  }
   0xf   :  { %805 = vsyncadd [#allocation3], 4294965248 }
  0x10   :  { %806 = dma.done.wait [#allocation5], 3072  }
  0x11   :  { %807 = vsyncadd [#allocation5], 4294964224 }
  0x12   :  { %808 = dma.done.wait [#allocation8], 1024  }
  0x13   :  { %809 = vsyncadd [#allocation8], 4294966272  ;;  %v672_v0 = vld [vmem:[#allocation4 + $0x38] sm:$0xff]  ;;  %v671_v2 = vld [vmem:[#allocation4 + $0x30] sm:$0xff]  ;;  %vm521_vm0 = vcmask 80896  }
  0x14   :  { %v680_v1 = vld [vmem:[#allocation4 + $0x78] sm:$0xff]  ;;  %245 = vmatpush.bf16.msra.mxu0 %v672_v0  ;;  %v679_v3 = vld [vmem:[#allocation4 + $0x70] sm:$0xff]  ;;  %v670_v4 = vld [vmem:[#allocation4 + $0x28] sm:$0xff] }
  0x15   :  { %274 = vmatpush.bf16.msra.mxu1 %v680_v1  ;;  %v678_v5 = vld [vmem:[#allocation4 + $0x68] sm:$0xff]  ;;  %v669_v6 = vld [vmem:[#allocation4 + $0x20] sm:$0xff]  ;;  %v668_v8 = vld [vmem:[#allocation4 + $0x18] sm:$0xff] }
  0x16   :  { %v677_v7 = vld [vmem:[#allocation4 + $0x60] sm:$0xff]  ;;  %v676_v9 = vld [vmem:[#allocation4 + $0x58] sm:$0xff]  ;;  %v667_v10 = vld [vmem:[#allocation4 + $0x10] sm:$0xff] }
  0x17   :  { %v675_v11 = vld [vmem:[#allocation4 + $0x50] sm:$0xff]  ;;  %v666_v12 = vld [vmem:[#allocation4 + $0x8] sm:$0xff]  ;;  %v665_v14 = vld [vmem:[#allocation4] sm:$0xff] }
  0x18   :  { %246 = vmatpush.bf16.msra.mxu0 %v671_v2  ;;  %v674_v13 = vld [vmem:[#allocation4 + $0x48] sm:$0xff]  ;;  %v673_v15 = vld [vmem:[#allocation4 + $0x40] sm:$0xff]  ;;  %v91_v17 = vld [vmem:[#allocation2 + $0x10] sm:$0xff] }
  0x19   :  { %275 = vmatpush.bf16.msra.mxu1 %v679_v3  ;;  %v89_v16 = vld [vmem:[#allocation2] sm:$0xff]  ;;  %v90_v18 = vld [vmem:[#allocation2 + $0x8] sm:$0xff]  ;;  %v92_v19 = vld [vmem:[#allocation2 + $0x18] sm:$0xff] }
  0x1a   :  { %v105_v20 = vpack.c.bf16 %v91_v17, %v89_v16  ;;  %v106_v21 = vpack.c.bf16 %v92_v19, %v90_v18  ;;  %v93_v22 = vld [vmem:[#allocation2 + $0x20] sm:$0xff]  ;;  %v95_v23 = vld [vmem:[#allocation2 + $0x30] sm:$0xff]  ;;  %v94_v24 = vld [vmem:[#allocation2 + $0x28] sm:$0xff] }
  0x1b   :  { %v96_v25 = vld [vmem:[#allocation2 + $0x38] sm:$0xff]  ;;  %v107_v26 = vpack.c.bf16 %v95_v23, %v93_v22  ;;  %v687_v29 = vld [vmem:[#allocation6 + $0x30] sm:$0xff]  ;;  %v686_v30 = vld [vmem:[#allocation6 + $0x28] sm:$0xff] }
  0x1c   :  { %247 = vmatpush.bf16.msra.mxu0 %v670_v4  ;;  %v108_v27 = vpack.c.bf16 %v96_v25, %v94_v24  ;;  %v688_v28 = vld [vmem:[#allocation6 + $0x38] sm:$0xff]  ;;  %v97_v31 = vld [vmem:[#allocation2 + $0x40] sm:$0xff]  ;;  %v99_v32 = vld [vmem:[#allocation2 + $0x50] sm:$0xff] }
  0x1d   :  { %276 = vmatpush.bf16.msra.mxu1 %v678_v5  ;;  %383 = vmatpush.bf16.msra.mxu2 %v688_v28  ;;  %v98_v33 = vld [vmem:[#allocation2 + $0x48] sm:$0xff]  ;;  %v100_v34 = vld [vmem:[#allocation2 + $0x58] sm:$0xff]  ;;  %v685_v35 = vld [vmem:[#allocation6 + $0x20] sm:$0xff]  ;;  %v109_v36 = vpack.c.bf16 %v99_v32, %v97_v31 }
  0x1e   :  { %v110_v37 = vpack.c.bf16 %v100_v34, %v98_v33  ;;  %v101_v38 = vld [vmem:[#allocation2 + $0x60] sm:$0xff]  ;;  %v103_v39 = vld [vmem:[#allocation2 + $0x70] sm:$0xff]  ;;  %v102_v40 = vld [vmem:[#allocation2 + $0x68] sm:$0xff] }
  0x1f   :  { %v104_v41 = vld [vmem:[#allocation2 + $0x78] sm:$0xff]  ;;  %v111_v42 = vpack.c.bf16 %v103_v39, %v101_v38  ;;  %v683_v45 = vld [vmem:[#allocation6 + $0x10] sm:$0xff]  ;;  %v682_v46 = vld [vmem:[#allocation6 + $0x8] sm:$0xff] }
  0x20   :  { %248 = vmatpush.bf16.msra.mxu0 %v669_v6  ;;  %v112_v43 = vpack.c.bf16 %v104_v41, %v102_v40  ;;  %v684_v44 = vld [vmem:[#allocation6 + $0x18] sm:$0xff]  ;;  %v681_v47 = vld [vmem:[#allocation6] sm:$0xff]  ;;  %v691_v34 = vld [vmem:[#allocation7 + $0x10] sm:$0xff] }
  0x21   :  { %277 = vmatpush.bf16.msra.mxu1 %v677_v7  ;;  %384 = vmatpush.bf16.msra.mxu2 %v687_v29  ;;  %v705_v50 = vld [vmem:[%s913_s2] ss:$0 sm:$0xff]  ;;  %v692_v33 = vld [vmem:[#allocation7 + $0x18] sm:$0xff] }
  0x22   :  { %v693_v18 = vld [vmem:[#allocation7 + $0x20] sm:$0xff] }
  0x23   :  { %v706_v38 = vld [vmem:[%s915_s4] ss:$0 sm:$0xff] }
  0x24   :  { %249 = vmatpush.bf16.msra.mxu0 %v668_v8 }
  0x25   :  { %278 = vmatpush.bf16.msra.mxu1 %v676_v9  ;;  %385 = vmatpush.bf16.msra.mxu2 %v686_v30  ;;  %v696_v9 = vld [vmem:[#allocation7 + $0x38] sm:$0xff] }
  0x26   :  { %492 = vmatpush.bf16.msra.mxu3 %v696_v9 }
  0x28   :  { %250 = vmatpush.bf16.msra.mxu0 %v667_v10  ;;  %v695_v10 = vld [vmem:[#allocation7 + $0x30] sm:$0xff] }
  0x29   :  { %279 = vmatpush.bf16.msra.mxu1 %v675_v11  ;;  %386 = vmatpush.bf16.msra.mxu2 %v685_v35  ;;  %v690_v35 = vld [vmem:[#allocation7 + $0x8] sm:$0xff] }
  0x2a   :  { %493 = vmatpush.bf16.msra.mxu3 %v695_v10 }
  0x2c   :  { %251 = vmatpush.bf16.msra.mxu0 %v666_v12  ;;  %v694_v12 = vld [vmem:[#allocation7 + $0x28] sm:$0xff] }
  0x2d   :  { %280 = vmatpush.bf16.msra.mxu1 %v674_v13  ;;  %387 = vmatpush.bf16.msra.mxu2 %v684_v44 }
  0x2e   :  { %494 = vmatpush.bf16.msra.mxu3 %v694_v12 }
  0x30   :  { %252 = vmatpush.bf16.msra.mxu0 %v665_v14 }
  0x31   :  { %281 = vmatpush.bf16.msra.mxu1 %v673_v15  ;;  %388 = vmatpush.bf16.msra.mxu2 %v683_v45 }
  0x32   :  { %495 = vmatpush.bf16.msra.mxu3 %v693_v18 }
  0x33   :  { %253 = vmatmul.bf16.vlgmr.msra.gmra.mxu0 %v105_v20 }
  0x34   :  { %282 = vmatmul.bf16.vlgmr.msra.gmra.mxu1 %v106_v21 }
  0x35   :  { %389 = vmatpush.bf16.msra.mxu2 %v682_v46 }
  0x36   :  { %496 = vmatpush.bf16.msra.mxu3 %v692_v33 }
  0x39   :  { %390 = vmatpush.bf16.msra.mxu2 %v681_v47 }
  0x3a   :  { %497 = vmatpush.bf16.msra.mxu3 %v691_v34 }
  0x3e   :  { %498 = vmatpush.bf16.msra.mxu3 %v690_v35 }
  0x43   :  { %258 = vmatmul.bf16.gmra.mxu0 %v107_v26 }
  0x44   :  { %287 = vmatmul.bf16.gmra.mxu1 %v108_v27 }
  0x53   :  { %263 = vmatmul.bf16.gmra.mxu0 %v109_v36  ;;  %v689_v36 = vld [vmem:[#allocation7] sm:$0xff] }
  0x54   :  { %292 = vmatmul.bf16.gmra.mxu1 %v110_v37  ;;  %499 = vmatpush.bf16.msra.mxu3 %v689_v36 }
  0x63   :  { %268 = vmatmul.bf16.gmra.mxu0 %v111_v42 }
  0x64   :  { %297 = vmatmul.bf16.gmra.mxu1 %v112_v43 }
  0xb0   :  { %v254_v48 = vpop.f32.mrf.mxu0 }
  0xb1   :  { %v283_v49 = vpop.f32.mrf.mxu1  ;;  %v255_v51 = vadd.f32 %v705_v50, %v254_v48 }
  0xb3   :  { %v284_v54 = vadd.f32 %v283_v49, %v255_v51 }
  0xb5   :  { %v303_v57 = vmax.f32 %v284_v54, 0.0 }
  0xb8   :  { %v256_v52 = vpop.f32.mrf.mxu0 }
  0xb9   :  { %v285_v53 = vpop.f32.mrf.mxu1  ;;  %v257_v55 = vadd.f32 %v705_v50, %v256_v52 }
  0xbb   :  { %v286_v56 = vadd.f32 %v285_v53, %v257_v55 }
  0xbd   :  { %v304_v58 = vmax.f32 %v286_v56, 0.0 }
  0xbf   :  { %v311_v59 = vpack.c.bf16 %v304_v58, %v303_v57 }
  0xc0   :  { %v259_v60 = vpop.f32.mrf.mxu0 }
  0xc1   :  { %v288_v61 = vpop.f32.mrf.mxu1  ;;  %391 = vmatmul.bf16.vlgmr.msra.gmra.mxu2 %v311_v59  ;;  %v260_v62 = vadd.f32 %v705_v50, %v259_v60 }
  0xc3   :  { %v289_v1 = vadd.f32 %v288_v61, %v260_v62 }
  0xc5   :  { %v305_v4 = vmax.f32 %v289_v1, 0.0 }
  0xc8   :  { %v261_v63 = vpop.f32.mrf.mxu0 }
  0xc9   :  { %v290_v0 = vpop.f32.mrf.mxu1  ;;  %v262_v2 = vadd.f32 %v705_v50, %v261_v63 }
  0xcb   :  { %v291_v3 = vadd.f32 %v290_v0, %v262_v2  ;;  %v707_v2 = vld [vmem:[%s917_s6] ss:$0 sm:$0xff] }
  0xcd   :  { %v306_v5 = vmax.f32 %v291_v3, 0.0 }
  0xcf   :  { %v312_v6 = vpack.c.bf16 %v306_v5, %v305_v4 }
  0xd0   :  { %v264_v7 = vpop.f32.mrf.mxu0 }
  0xd1   :  { %v293_v8 = vpop.f32.mrf.mxu1  ;;  %396 = vmatmul.bf16.gmra.mxu2 %v312_v6  ;;  %v265_v11 = vadd.f32 %v705_v50, %v264_v7 }
  0xd3   :  { %v294_v15 = vadd.f32 %v293_v8, %v265_v11 }
  0xd5   :  { %v307_v19 = vmax.f32 %v294_v15, 0.0 }
  0xd8   :  { %v266_v13 = vpop.f32.mrf.mxu0 }
  0xd9   :  { %v295_v14 = vpop.f32.mrf.mxu1  ;;  %v267_v16 = vadd.f32 %v705_v50, %v266_v13 }
  0xdb   :  { %v296_v17 = vadd.f32 %v295_v14, %v267_v16 }
  0xdd   :  { %v308_v20 = vmax.f32 %v296_v17, 0.0 }
  0xdf   :  { %v313_v21 = vpack.c.bf16 %v308_v20, %v307_v19 }
  0xe0   :  { %v269_v22 = vpop.f32.mrf.mxu0 }
  0xe1   :  { %v298_v23 = vpop.f32.mrf.mxu1  ;;  %401 = vmatmul.bf16.gmra.mxu2 %v313_v21  ;;  %v270_v24 = vadd.f32 %v705_v50, %v269_v22 }
  0xe3   :  { %v299_v26 = vadd.f32 %v298_v23, %v270_v24 }
  0xe5   :  { %v309_v30 = vmax.f32 %v299_v26, 0.0 }
  0xe8   :  { %v271_v25 = vpop.f32.mrf.mxu0 }
  0xe9   :  { %v272_v27 = vadd.f32 %v705_v50, %v271_v25  ;;  %v300_v28 = vpop.f32.mrf.mxu1 }
  0xeb   :  { %v301_v29 = vadd.f32 %v300_v28, %v272_v27 }
  0xed   :  { %v310_v31 = vmax.f32 %v301_v29, 0.0 }
  0xef   :  { %v314_v32 = vpack.c.bf16 %v310_v31, %v309_v30 }
  0xf1   :  { %406 = vmatmul.bf16.gmra.mxu2 %v314_v32 }
 0x144   :  { %v392_v37 = vpop.f32.mrf.mxu2 }
 0x145   :  { %v393_v39 = vadd.f32 %v706_v38, %v392_v37 }
 0x147   :  { %v412_v42 = vmax.f32 %v393_v39, 0.0 }
 0x14c   :  { %v394_v40 = vpop.f32.mrf.mxu2 }
 0x14d   :  { %v395_v41 = vadd.f32 %v706_v38, %v394_v40 }
 0x14f   :  { %v413_v43 = vmax.f32 %v395_v41, 0.0 }
 0x151   :  { %v420_v44 = vpack.c.bf16 %v413_v43, %v412_v42 }
 0x153   :  { %500 = vmatmul.bf16.vlgmr.msra.gmra.mxu3 %v420_v44 }
 0x154   :  { %v397_v45 = vpop.f32.mrf.mxu2 }
 0x155   :  { %v398_v46 = vadd.f32 %v706_v38, %v397_v45 }
 0x157   :  { %v414_v49 = vmax.f32 %v398_v46, 0.0 }
 0x15c   :  { %v399_v47 = vpop.f32.mrf.mxu2 }
 0x15d   :  { %v400_v48 = vadd.f32 %v706_v38, %v399_v47 }
 0x15f   :  { %v415_v50 = vmax.f32 %v400_v48, 0.0 }
 0x161   :  { %v421_v51 = vpack.c.bf16 %v415_v50, %v414_v49 }
 0x163   :  { %505 = vmatmul.bf16.gmra.mxu3 %v421_v51 }
 0x164   :  { %v402_v52 = vpop.f32.mrf.mxu2 }
 0x165   :  { %v403_v53 = vadd.f32 %v706_v38, %v402_v52 }
 0x167   :  { %v416_v56 = vmax.f32 %v403_v53, 0.0 }
 0x16c   :  { %v404_v54 = vpop.f32.mrf.mxu2 }
 0x16d   :  { %v405_v55 = vadd.f32 %v706_v38, %v404_v54 }
 0x16f   :  { %v417_v57 = vmax.f32 %v405_v55, 0.0 }
 0x171   :  { %v422_v58 = vpack.c.bf16 %v417_v57, %v416_v56 }
 0x173   :  { %510 = vmatmul.bf16.gmra.mxu3 %v422_v58 }
 0x174   :  { %v407_v59 = vpop.f32.mrf.mxu2 }
 0x175   :  { %v408_v60 = vadd.f32 %v706_v38, %v407_v59 }
 0x177   :  { %v418_v63 = vmax.f32 %v408_v60, 0.0 }
 0x17c   :  { %v409_v61 = vpop.f32.mrf.mxu2 }
 0x17d   :  { %v410_v62 = vadd.f32 %v706_v38, %v409_v61 }
 0x17f   :  { %v419_v0 = vmax.f32 %v410_v62, 0.0 }
 0x181   :  { %v423_v1 = vpack.c.bf16 %v419_v0, %v418_v63 }
 0x183   :  { %515 = vmatmul.bf16.gmra.mxu3 %v423_v1 }
 0x1d6   :  { %v501_v3 = vpop.f32.mrf.mxu3 }
 0x1d7   :  { %v502_v4 = vadd.f32 %v707_v2, %v501_v3 }
 0x1d9   :  { %522 = vst.msk [vmem:[%s918_s7] sm:$0xff] %vm521_vm0, %v502_v4 }
 0x1de   :  { %v503_v5 = vpop.f32.mrf.mxu3 }
 0x1df   :  { %v504_v6 = vadd.f32 %v707_v2, %v503_v5 }
 0x1e1   :  { %523 = vst.msk [vmem:[%s918_s7 + $0x8] sm:$0xff] %vm521_vm0, %v504_v6 }
 0x1e6   :  { %v506_v7 = vpop.f32.mrf.mxu3 }
 0x1e7   :  { %v507_v8 = vadd.f32 %v707_v2, %v506_v7 }
 0x1e9   :  { %524 = vst.msk [vmem:[%s918_s7 + $0x10] sm:$0xff] %vm521_vm0, %v507_v8 }
 0x1ee   :  { %v508_v9 = vpop.f32.mrf.mxu3 }
 0x1ef   :  { %v509_v10 = vadd.f32 %v707_v2, %v508_v9 }
 0x1f1   :  { %525 = vst.msk [vmem:[%s918_s7 + $0x18] sm:$0xff] %vm521_vm0, %v509_v10 }
 0x1f6   :  { %v511_v11 = vpop.f32.mrf.mxu3 }
 0x1f7   :  { %v512_v12 = vadd.f32 %v707_v2, %v511_v11 }
 0x1f9   :  { %526 = vst.msk [vmem:[%s918_s7 + $0x20] sm:$0xff] %vm521_vm0, %v512_v12 }
 0x1fe   :  { %v513_v13 = vpop.f32.mrf.mxu3 }
 0x1ff   :  { %v514_v14 = vadd.f32 %v707_v2, %v513_v13 }
 0x201   :  { %527 = vst.msk [vmem:[%s918_s7 + $0x28] sm:$0xff] %vm521_vm0, %v514_v14 }
 0x206   :  { %v516_v15 = vpop.f32.mrf.mxu3 }
 0x207   :  { %v517_v16 = vadd.f32 %v707_v2, %v516_v15 }
 0x209   :  { %528 = vst.msk [vmem:[%s918_s7 + $0x30] sm:$0xff] %vm521_vm0, %v517_v16 }
 0x20e   :  { %v518_v17 = vpop.f32.mrf.mxu3 }
 0x20f   :  { %v519_v18 = vadd.f32 %v707_v2, %v518_v17 }
 0x211   :  { %529 = vst.msk [vmem:[%s918_s7 + $0x38] sm:$0xff] %vm521_vm0, %v519_v18 }
 0x212   :  { %534 = vsyncpa [#allocation3], 1 }
 0x213   :  { %535 = vsyncpa [#allocation5], 1 }
 0x214   :  { %536 = vsyncpa [#allocation8], 1 }

</bundles_post_ra>
